<compile_context>
chip_gen: v7x
topology: tpu7x:2x2x1
jax: 0.10.0
libtpu: 0.0.40
codegen_flags: <defaults>
</compile_context>

<pallas_src>
import functools

import jax
import jax.numpy as jnp
from jax.experimental import pallas as pl
from jax.experimental.pallas import tpu as pltpu


def _round_up(x, m):
    return ((x + m - 1) // m) * m


def _has_two_tensorcores():
    """True on v7x-class chips (2 TensorCores per chip)."""
    try:
        kind = jax.devices()[0].device_kind.lower()
    except Exception:  # pragma: no cover - defensive
        return False
    return "v7" in kind


# ---------------------------------------------------------------------------
# Kernels
# ---------------------------------------------------------------------------
def _iql_merged_kernel(x_ref, w1_ref, w2_ref, wq_ref, b1_ref, b2_ref, bq_ref,
                       q_ref, *, hidden, qpad):
    """Single grid step, both nets merged along the layer-1 output axis.

    x_ref : (Bp, D_in)      bf16
    w1_ref: (D_in, 2H)      bf16   [online | target] concatenated
    w2_ref: (2, H, H)       bf16   stacked per net
    wq_ref: (2, H, QPAD)    bf16   per-net fused Q head, lane padded
    b1_ref: (1, 2H)  b2_ref: (2,1,H)  bq_ref: (2,1,QPAD)   f32
    q_ref : (Bp, 2*QPAD)    f32    [online Q slab | target Q slab]
    """
    x = x_ref[...]
    # layer 1: one 2H-wide (=256) MXU matmul serves both nets
    h1 = jnp.dot(x, w1_ref[...], preferred_element_type=jnp.float32) + b1_ref[...]
    h1 = jnp.maximum(h1, 0.0).astype(jnp.bfloat16)

    for n in range(2):                               # static unroll: 0=online,1=target
        h1n = h1[:, n * hidden:(n + 1) * hidden]     # lane-aligned 128-wide slice
        h2n = jnp.dot(h1n, w2_ref[n], preferred_element_type=jnp.float32) + b2_ref[n]
        h2n = jnp.maximum(h2n, 0.0).astype(jnp.bfloat16)
        qn = jnp.dot(h2n, wq_ref[n], preferred_element_type=jnp.float32) + bq_ref[n]
        q_ref[:, n * qpad:(n + 1) * qpad] = qn       # unmasked lane-dense store


def _iql_percore_kernel(x_ref, w1_ref, w2_ref, wq_ref, b1_ref, b2_ref, bq_ref,
                        q_ref):
    """One grid step == one net (v7x: one net per TensorCore)."""
    x = x_ref[...]                                   # (Bp, D_in) bf16, shared
    h1 = jnp.dot(x, w1_ref[0], preferred_element_type=jnp.float32) + b1_ref[0]
    h1 = jnp.maximum(h1, 0.0).astype(jnp.bfloat16)
    h2 = jnp.dot(h1, w2_ref[0], preferred_element_type=jnp.float32) + b2_ref[0]
    h2 = jnp.maximum(h2, 0.0).astype(jnp.bfloat16)
    q_ref[0] = jnp.dot(h2, wq_ref[0], preferred_element_type=jnp.float32) + bq_ref[0]


# ---------------------------------------------------------------------------
# pallas_call wrappers
# ---------------------------------------------------------------------------
def _weight_bytes(arrays):
    return int(sum(int(v.size) * v.dtype.itemsize for v in arrays.values()))


def _double_q_merged(x, a, H, QPAD):
    Bp, D_in = x.shape
    flops = 2 * Bp * (D_in * 2 * H + 2 * H * H + 2 * H * QPAD)
    bytes_accessed = _weight_bytes(a) + int(x.size) * 2 + Bp * 2 * QPAD * 4
    kernel = functools.partial(_iql_merged_kernel, hidden=H, qpad=QPAD)
    return pl.pallas_call(
        kernel,
        out_shape=jax.ShapeDtypeStruct((Bp, 2 * QPAD), jnp.float32),
        grid=(1,),
        in_specs=[
            pl.BlockSpec((Bp, D_in), lambda i: (0, 0)),        # x
            pl.BlockSpec((D_in, 2 * H), lambda i: (0, 0)),     # w1 merged
            pl.BlockSpec((2, H, H), lambda i: (0, 0, 0)),      # w2 stacked
            pl.BlockSpec((2, H, QPAD), lambda i: (0, 0, 0)),   # wq stacked
            pl.BlockSpec((1, 2 * H), lambda i: (0, 0)),        # b1 merged
            pl.BlockSpec((2, 1, H), lambda i: (0, 0, 0)),      # b2 stacked
            pl.BlockSpec((2, 1, QPAD), lambda i: (0, 0, 0)),   # bq stacked
        ],
        out_specs=pl.BlockSpec((Bp, 2 * QPAD), lambda i: (0, 0)),
        compiler_params=pltpu.CompilerParams(
            dimension_semantics=("arbitrary",)),
        cost_estimate=pl.CostEstimate(
            flops=flops, transcendentals=0, bytes_accessed=bytes_accessed),
    )(x, a["w1"], a["w2"], a["wq"], a["b1"], a["b2"], a["bq"])


def _double_q_percore(x, a, H, QPAD):
    Bp, D_in = x.shape
    flops = 2 * 2 * Bp * (D_in * H + H * H + H * QPAD)
    bytes_accessed = _weight_bytes(a) + int(x.size) * 2 + 2 * Bp * QPAD * 4
    return pl.pallas_call(
        _iql_percore_kernel,
        out_shape=jax.ShapeDtypeStruct((2, Bp, QPAD), jnp.float32),
        grid=(2,),
        in_specs=[
            pl.BlockSpec((Bp, D_in), lambda n: (0, 0)),          # x (shared)
            pl.BlockSpec((1, D_in, H), lambda n: (n, 0, 0)),     # w1 per net
            pl.BlockSpec((1, H, H), lambda n: (n, 0, 0)),        # w2 per net
            pl.BlockSpec((1, H, QPAD), lambda n: (n, 0, 0)),     # wq per net
            pl.BlockSpec((1, 1, H), lambda n: (n, 0, 0)),        # b1 per net
            pl.BlockSpec((1, 1, H), lambda n: (n, 0, 0)),        # b2 per net
            pl.BlockSpec((1, 1, QPAD), lambda n: (n, 0, 0)),     # bq per net
        ],
        out_specs=pl.BlockSpec((1, Bp, QPAD), lambda n: (n, 0, 0)),
        compiler_params=pltpu.CompilerParams(
            dimension_semantics=("parallel",)),                  # v7x: 1 net / TC
        cost_estimate=pl.CostEstimate(
            flops=flops, transcendentals=0, bytes_accessed=bytes_accessed),
    )(x, a["w1"], a["w2"], a["wq"], a["b1"], a["b2"], a["bq"])


# ---------------------------------------------------------------------------
# Parameters (synthetic double-Q net) + ONE-TIME packing for the fused kernel.
# ---------------------------------------------------------------------------
def init_params(key, d_in, hidden, n_actions):
    ks = jax.random.split(key, 8)
    s1 = (2.0 / d_in) ** 0.5
    s2 = (2.0 / hidden) ** 0.5
    return {
        "w1": (s1 * jax.random.normal(ks[0], (d_in, hidden), jnp.float32)).astype(jnp.bfloat16),
        "b1": 0.01 * jax.random.normal(ks[1], (hidden,), jnp.float32),
        "w2": (s2 * jax.random.normal(ks[2], (hidden, hidden), jnp.float32)).astype(jnp.bfloat16),
        "b2": 0.01 * jax.random.normal(ks[3], (hidden,), jnp.float32),
        "wq1": (s2 * jax.random.normal(ks[4], (hidden, n_actions), jnp.float32)).astype(jnp.bfloat16),
        "bq1": 0.01 * jax.random.normal(ks[5], (n_actions,), jnp.float32),
        "wq2": (s2 * jax.random.normal(ks[6], (hidden, n_actions), jnp.float32)).astype(jnp.bfloat16),
        "bq2": 0.01 * jax.random.normal(ks[7], (n_actions,), jnp.float32),
    }


def pack_iql_params(online, target, n_actions, two_core=None):
    """Pack online/target params for the fused kernel.

    Call ONCE (after weight updates / target sync), NOT per forward: packing
    rewrites every weight and would otherwise dominate the tiny forward.
    """
    if two_core is None:
        two_core = _has_two_tensorcores()
    H = online["w1"].shape[1]
    A = n_actions
    QPAD = max(128, _round_up(2 * A, 128))   # lane-dense fused Q-head width

    def head(p):
        wq = jnp.concatenate([p["wq1"], p["wq2"]], axis=1)          # (H, 2A)
        wq = jnp.pad(wq, ((0, 0), (0, QPAD - 2 * A))).astype(jnp.bfloat16)
        bq = jnp.pad(jnp.concatenate([p["bq1"], p["bq2"]], 0),
                     (0, QPAD - 2 * A)).astype(jnp.float32)
        return wq, bq

    owq, obq = head(online)
    twq, tbq = head(target)

    arrays = {
        "w2": jnp.stack([online["w2"], target["w2"]], 0),                    # (2,H,H) bf16
        "wq": jnp.stack([owq, twq], 0),                                      # (2,H,QPAD) bf16
        "b2": jnp.stack([online["b2"], target["b2"]], 0).reshape(2, 1, H).astype(jnp.float32),
        "bq": jnp.stack([obq, tbq], 0).reshape(2, 1, QPAD),
    }
    if two_core:
        arrays["w1"] = jnp.stack([online["w1"], target["w1"]], 0)            # (2,D_in,H)
        arrays["b1"] = jnp.stack([online["b1"], target["b1"]], 0).reshape(2, 1, H).astype(jnp.float32)
    else:
        arrays["w1"] = jnp.concatenate([online["w1"], target["w1"]], axis=1)  # (D_in,2H)
        arrays["b1"] = jnp.concatenate([online["b1"], target["b1"]], 0).reshape(1, 2 * H).astype(jnp.float32)

    meta = {"hidden": int(H), "qpad": int(QPAD), "n_actions": int(A),
            "two_core": bool(two_core)}
    return {"meta": meta, "arrays": arrays}


# ---------------------------------------------------------------------------
# IQL.forward mirror.
# ---------------------------------------------------------------------------
@functools.partial(jax.jit, static_argnames=("hidden", "qpad", "n_actions", "two_core"))
def _iql_apply(x_flat, arrays, *, hidden, qpad, n_actions, two_core):
    B, _ = x_flat.shape
    Bp = _round_up(max(B, 16), 16)           # bf16 sublane packing / MXU rows
    if Bp != B:
        x_flat = jnp.pad(x_flat, ((0, Bp - B), (0, 0)))

    if two_core:
        out = _double_q_percore(x_flat, arrays, hidden, qpad)   # (2, Bp, QPAD)
        q, tq = out[0], out[1]
        q1, q2 = q[:B, :n_actions], q[:B, n_actions:2 * n_actions]
        tq1, tq2 = tq[:B, :n_actions], tq[:B, n_actions:2 * n_actions]
    else:
        out = _double_q_merged(x_flat, arrays, hidden, qpad)    # (Bp, 2*QPAD)
        q1 = out[:B, :n_actions]
        q2 = out[:B, n_actions:2 * n_actions]
        tq1 = out[:B, qpad:qpad + n_actions]
        tq2 = out[:B, qpad + n_actions:qpad + 2 * n_actions]
    return q1, q2, tq1, tq2


def iql_forward(inputs_nchw, core_state, packed):
    """inputs_nchw: [B, C, H, W] observation. `packed` from pack_iql_params."""
    iql_core, target_iql_core = core_state
    B = inputs_nchw.shape[0]
    x_flat = inputs_nchw.reshape(B, -1).astype(jnp.bfloat16)   # torch .view flatten

    q1, q2, tq1, tq2 = _iql_apply(x_flat, packed["arrays"], **packed["meta"])

    # target net runs under torch.no_grad() -> stop_gradient
    iql_output = {
        "q1": q1,
        "q2": q2,
        "target_q1": jax.lax.stop_gradient(tq1),
        "target_q2": jax.lax.stop_gradient(tq2),
    }
    # IQL.forward returns the *input* core_state tuple unchanged — reproduced.
    return iql_output, (iql_core, target_iql_core)


# Plain-JAX reference (same dtype path) for correctness checking.
def _q_net_ref(x_flat_bf16, p):
    h1 = jnp.dot(x_flat_bf16, p["w1"], preferred_element_type=jnp.float32) + p["b1"]
    h1 = jnp.maximum(h1, 0.0).astype(jnp.bfloat16)
    h2 = jnp.dot(h1, p["w2"], preferred_element_type=jnp.float32) + p["b2"]
    h2 = jnp.maximum(h2, 0.0).astype(jnp.bfloat16)
    q1 = jnp.dot(h2, p["wq1"], preferred_element_type=jnp.float32) + p["bq1"]
    q2 = jnp.dot(h2, p["wq2"], preferred_element_type=jnp.float32) + p["bq2"]
    return q1, q2


if __name__ == "__main__":
    key = jax.random.PRNGKey(0)
    k_obs, k_par = jax.random.split(key)

    # small shapes consistent with an NCHW observation encoder
    B, C, Hs, Ws = 8, 4, 16, 16
    HIDDEN, N_ACTIONS = 128, 16
    D_IN = C * Hs * Ws

    obs = jax.random.normal(k_obs, (B, C, Hs, Ws), jnp.float32)

    online_params = init_params(k_par, D_IN, HIDDEN, N_ACTIONS)
    # target_iql_net.load_state_dict(iql_net.state_dict()) -> identical copy
    target_params = jax.tree_util.tree_map(lambda x: x, online_params)

    # placeholder core state (see TODO above)
    core = (jnp.zeros((B, HIDDEN), jnp.float32),
            jnp.zeros((B, HIDDEN), jnp.float32))

    # plain-JAX reference
    x_flat = obs.reshape(B, -1).astype(jnp.bfloat16)
    q1_ref, q2_ref = _q_net_ref(x_flat, online_params)

    auto_two_core = _has_two_tensorcores()
    # Exercise both execution paths (merged single-step for v5e/v6e, per-core
    # parallel grid for v7x); both are valid on any chip.
    for two_core in (False, True):
        packed = pack_iql_params(online_params, target_params, N_ACTIONS,
                                 two_core=two_core)   # packed ONCE, reused per fwd
        out, new_core = iql_forward(obs, core, packed)
        jax.block_until_ready(out)

        assert out["q1"].shape == (B, N_ACTIONS)
        assert out["q2"].shape == (B, N_ACTIONS)
        assert out["target_q1"].shape == (B, N_ACTIONS)
        assert out["target_q2"].shape == (B, N_ACTIONS)
        assert bool(jnp.all(jnp.isfinite(out["q1"])))
        assert bool(jnp.all(jnp.isfinite(out["q2"])))

        # target net is a copy of the online net (same dtype/compute path)
        assert bool(jnp.allclose(out["q1"], out["target_q1"]))
        assert bool(jnp.allclose(out["q2"], out["target_q2"]))

        # correctness vs. plain-JAX reference
        assert bool(jnp.allclose(out["q1"], q1_ref, rtol=2e-2, atol=2e-2))
        assert bool(jnp.allclose(out["q2"], q2_ref, rtol=2e-2, atol=2e-2))

        # core_state passes through unchanged
        assert bool(jnp.all(new_core[0] == core[0]))
        assert bool(jnp.all(new_core[1] == core[1]))

    # the path that would be auto-selected on this device also works
    packed_auto = pack_iql_params(online_params, target_params, N_ACTIONS,
                                  two_core=auto_two_core)
    out_auto, _ = iql_forward(obs, core, packed_auto)
    jax.block_until_ready(out_auto)

    print("KERNEL_OK")
</pallas_src>

<mosaic_0001>
module attributes {stable_mosaic.version = 11 : i64} {
  func.func @_iql_merged_kernel(%arg0: i32, %arg1: memref<16x1024xbf16, #tpu.memory_space<vmem>>, %arg2: memref<1024x256xbf16, #tpu.memory_space<vmem>>, %arg3: memref<2x128x128xbf16, #tpu.memory_space<vmem>>, %arg4: memref<2x128x128xbf16, #tpu.memory_space<vmem>>, %arg5: memref<1x256xf32, #tpu.memory_space<vmem>>, %arg6: memref<2x1x128xf32, #tpu.memory_space<vmem>>, %arg7: memref<2x1x128xf32, #tpu.memory_space<vmem>>, %arg8: memref<16x256xf32, #tpu.memory_space<vmem>>) attributes {dimension_semantics = [#tpu.dimension_semantics<arbitrary>], iteration_bounds = array<i64: 1>, scalar_prefetch = 0 : i64, scratch_operands = 0 : i64, tpu.core_type = #tpu.core_type<tc>, window_params = [{pipeline_mode = #tpu.pipeline_mode<synchronous>, transform_indices = @transform_0, window_bounds = array<i64: 16, 1024>}, {pipeline_mode = #tpu.pipeline_mode<synchronous>, transform_indices = @transform_1, window_bounds = array<i64: 1024, 256>}, {pipeline_mode = #tpu.pipeline_mode<synchronous>, transform_indices = @transform_2, window_bounds = array<i64: 2, 128, 128>}, {pipeline_mode = #tpu.pipeline_mode<synchronous>, transform_indices = @transform_3, window_bounds = array<i64: 2, 128, 128>}, {pipeline_mode = #tpu.pipeline_mode<synchronous>, transform_indices = @transform_4, window_bounds = array<i64: 1, 256>}, {pipeline_mode = #tpu.pipeline_mode<synchronous>, transform_indices = @transform_5, window_bounds = array<i64: 2, 1, 128>}, {pipeline_mode = #tpu.pipeline_mode<synchronous>, transform_indices = @transform_6, window_bounds = array<i64: 2, 1, 128>}, {pipeline_mode = #tpu.pipeline_mode<synchronous>, transform_indices = @transform_7, window_bounds = array<i64: 16, 256>}]} {
    %c0 = arith.constant 0 : index
    %c0_0 = arith.constant 0 : index
    %0 = vector.load %arg1[%c0, %c0_0] : memref<16x1024xbf16, #tpu.memory_space<vmem>>, vector<16x1024xbf16>
    %c0_1 = arith.constant 0 : index
    %c0_2 = arith.constant 0 : index
    %1 = vector.load %arg2[%c0_1, %c0_2] : memref<1024x256xbf16, #tpu.memory_space<vmem>>, vector<1024x256xbf16>
    %cst = arith.constant dense<0.000000e+00> : vector<16x256xf32>
    %2 = tpu.matmul %0, %1, %cst {dimension_numbers = #tpu.dot_dimension_numbers<[1], [0], [0], [1], [0, 0, 1, 1], [], []>} : vector<16x1024xbf16>, vector<1024x256xbf16>, vector<16x256xf32> -> vector<16x256xf32>
    %c0_3 = arith.constant 0 : index
    %c0_4 = arith.constant 0 : index
    %3 = vector.load %arg5[%c0_3, %c0_4] : memref<1x256xf32, #tpu.memory_space<vmem>>, vector<1x256xf32>
    %4 = vector.broadcast %3 : vector<1x256xf32> to vector<16x256xf32>
    %5 = arith.addf %2, %4 : vector<16x256xf32>
    %cst_5 = arith.constant 0.000000e+00 : f32
    %6 = vector.broadcast %cst_5 : f32 to vector<16x256xf32>
    %7 = arith.maximumf %5, %6 : vector<16x256xf32>
    %8 = arith.truncf %7 : vector<16x256xf32> to vector<16x256xbf16>
    %9 = vector.extract_strided_slice %8 {offsets = [0, 0], sizes = [16, 128], strides = [1, 1]} : vector<16x256xbf16> to vector<16x128xbf16>
    %c0_6 = arith.constant 0 : index
    %c0_7 = arith.constant 0 : index
    %c0_8 = arith.constant 0 : index
    %10 = vector.load %arg3[%c0_6, %c0_7, %c0_8] : memref<2x128x128xbf16, #tpu.memory_space<vmem>>, vector<1x128x128xbf16>
    %11 = vector.shape_cast %10 : vector<1x128x128xbf16> to vector<128x128xbf16>
    %cst_9 = arith.constant dense<0.000000e+00> : vector<16x128xf32>
    %12 = tpu.matmul %9, %11, %cst_9 {dimension_numbers = #tpu.dot_dimension_numbers<[1], [0], [0], [1], [0, 0, 1, 1], [], []>} : vector<16x128xbf16>, vector<128x128xbf16>, vector<16x128xf32> -> vector<16x128xf32>
    %c0_10 = arith.constant 0 : index
    %c0_11 = arith.constant 0 : index
    %c0_12 = arith.constant 0 : index
    %13 = vector.load %arg6[%c0_10, %c0_11, %c0_12] : memref<2x1x128xf32, #tpu.memory_space<vmem>>, vector<1x1x128xf32>
    %14 = vector.shape_cast %13 : vector<1x1x128xf32> to vector<1x128xf32>
    %15 = vector.broadcast %14 : vector<1x128xf32> to vector<16x128xf32>
    %16 = arith.addf %12, %15 : vector<16x128xf32>
    %cst_13 = arith.constant 0.000000e+00 : f32
    %17 = vector.broadcast %cst_13 : f32 to vector<16x128xf32>
    %18 = arith.maximumf %16, %17 : vector<16x128xf32>
    %19 = arith.truncf %18 : vector<16x128xf32> to vector<16x128xbf16>
    %c0_14 = arith.constant 0 : index
    %c0_15 = arith.constant 0 : index
    %c0_16 = arith.constant 0 : index
    %20 = vector.load %arg4[%c0_14, %c0_15, %c0_16] : memref<2x128x128xbf16, #tpu.memory_space<vmem>>, vector<1x128x128xbf16>
    %21 = vector.shape_cast %20 : vector<1x128x128xbf16> to vector<128x128xbf16>
    %cst_17 = arith.constant dense<0.000000e+00> : vector<16x128xf32>
    %22 = tpu.matmul %19, %21, %cst_17 {dimension_numbers = #tpu.dot_dimension_numbers<[1], [0], [0], [1], [0, 0, 1, 1], [], []>} : vector<16x128xbf16>, vector<128x128xbf16>, vector<16x128xf32> -> vector<16x128xf32>
    %c0_18 = arith.constant 0 : index
    %c0_19 = arith.constant 0 : index
    %c0_20 = arith.constant 0 : index
    %23 = vector.load %arg7[%c0_18, %c0_19, %c0_20] : memref<2x1x128xf32, #tpu.memory_space<vmem>>, vector<1x1x128xf32>
    %24 = vector.shape_cast %23 : vector<1x1x128xf32> to vector<1x128xf32>
    %25 = vector.broadcast %24 : vector<1x128xf32> to vector<16x128xf32>
    %26 = arith.addf %22, %25 : vector<16x128xf32>
    %c0_21 = arith.constant 0 : index
    %c0_22 = arith.constant 0 : index
    %27 = vector.load %arg8[%c0_21, %c0_22] : memref<16x256xf32, #tpu.memory_space<vmem>>, vector<16x128xf32>
    tpu.vector_store %arg8[%c0_21, %c0_22], %26 {strides = array<i32>} : memref<16x256xf32, #tpu.memory_space<vmem>>, vector<16x128xf32>,
    %28 = vector.extract_strided_slice %8 {offsets = [0, 128], sizes = [16, 128], strides = [1, 1]} : vector<16x256xbf16> to vector<16x128xbf16>
    %c1 = arith.constant 1 : index
    %c0_23 = arith.constant 0 : index
    %c0_24 = arith.constant 0 : index
    %29 = vector.load %arg3[%c1, %c0_23, %c0_24] : memref<2x128x128xbf16, #tpu.memory_space<vmem>>, vector<1x128x128xbf16>
    %30 = vector.shape_cast %29 : vector<1x128x128xbf16> to vector<128x128xbf16>
    %cst_25 = arith.constant dense<0.000000e+00> : vector<16x128xf32>
    %31 = tpu.matmul %28, %30, %cst_25 {dimension_numbers = #tpu.dot_dimension_numbers<[1], [0], [0], [1], [0, 0, 1, 1], [], []>} : vector<16x128xbf16>, vector<128x128xbf16>, vector<16x128xf32> -> vector<16x128xf32>
    %c1_26 = arith.constant 1 : index
    %c0_27 = arith.constant 0 : index
    %c0_28 = arith.constant 0 : index
    %32 = vector.load %arg6[%c1_26, %c0_27, %c0_28] : memref<2x1x128xf32, #tpu.memory_space<vmem>>, vector<1x1x128xf32>
    %33 = vector.shape_cast %32 : vector<1x1x128xf32> to vector<1x128xf32>
    %34 = vector.broadcast %33 : vector<1x128xf32> to vector<16x128xf32>
    %35 = arith.addf %31, %34 : vector<16x128xf32>
    %cst_29 = arith.constant 0.000000e+00 : f32
    %36 = vector.broadcast %cst_29 : f32 to vector<16x128xf32>
    %37 = arith.maximumf %35, %36 : vector<16x128xf32>
    %38 = arith.truncf %37 : vector<16x128xf32> to vector<16x128xbf16>
    %c1_30 = arith.constant 1 : index
    %c0_31 = arith.constant 0 : index
    %c0_32 = arith.constant 0 : index
    %39 = vector.load %arg4[%c1_30, %c0_31, %c0_32] : memref<2x128x128xbf16, #tpu.memory_space<vmem>>, vector<1x128x128xbf16>
    %40 = vector.shape_cast %39 : vector<1x128x128xbf16> to vector<128x128xbf16>
    %cst_33 = arith.constant dense<0.000000e+00> : vector<16x128xf32>
    %41 = tpu.matmul %38, %40, %cst_33 {dimension_numbers = #tpu.dot_dimension_numbers<[1], [0], [0], [1], [0, 0, 1, 1], [], []>} : vector<16x128xbf16>, vector<128x128xbf16>, vector<16x128xf32> -> vector<16x128xf32>
    %c1_34 = arith.constant 1 : index
    %c0_35 = arith.constant 0 : index
    %c0_36 = arith.constant 0 : index
    %42 = vector.load %arg7[%c1_34, %c0_35, %c0_36] : memref<2x1x128xf32, #tpu.memory_space<vmem>>, vector<1x1x128xf32>
    %43 = vector.shape_cast %42 : vector<1x1x128xf32> to vector<1x128xf32>
    %44 = vector.broadcast %43 : vector<1x128xf32> to vector<16x128xf32>
    %45 = arith.addf %41, %44 : vector<16x128xf32>
    %c0_37 = arith.constant 0 : index
    %c128 = arith.constant 128 : index
    %46 = vector.load %arg8[%c0_37, %c128] : memref<16x256xf32, #tpu.memory_space<vmem>>, vector<16x128xf32>
    tpu.vector_store %arg8[%c0_37, %c128], %45 {strides = array<i32>} : memref<16x256xf32, #tpu.memory_space<vmem>>, vector<16x128xf32>,
    return
  }
  func.func @transform_0(%arg0: i32) -> (i32, i32) {
    %c0_i32 = arith.constant 0 : i32
    %c0_i32_0 = arith.constant 0 : i32
    %c0_i32_1 = arith.constant 0 : i32
    return %c0_i32, %c0_i32_0 : i32, i32
  }
  func.func @transform_1(%arg0: i32) -> (i32, i32) {
    %c0_i32 = arith.constant 0 : i32
    %c0_i32_0 = arith.constant 0 : i32
    %c0_i32_1 = arith.constant 0 : i32
    return %c0_i32, %c0_i32_0 : i32, i32
  }
  func.func @transform_2(%arg0: i32) -> (i32, i32, i32) {
    %c0_i32 = arith.constant 0 : i32
    %c0_i32_0 = arith.constant 0 : i32
    %c0_i32_1 = arith.constant 0 : i32
    %c0_i32_2 = arith.constant 0 : i32
    return %c0_i32, %c0_i32_0, %c0_i32_1 : i32, i32, i32
  }
  func.func @transform_3(%arg0: i32) -> (i32, i32, i32) {
    %c0_i32 = arith.constant 0 : i32
    %c0_i32_0 = arith.constant 0 : i32
    %c0_i32_1 = arith.constant 0 : i32
    %c0_i32_2 = arith.constant 0 : i32
    return %c0_i32, %c0_i32_0, %c0_i32_1 : i32, i32, i32
  }
  func.func @transform_4(%arg0: i32) -> (i32, i32) {
    %c0_i32 = arith.constant 0 : i32
    %c0_i32_0 = arith.constant 0 : i32
    %c0_i32_1 = arith.constant 0 : i32
    return %c0_i32, %c0_i32_0 : i32, i32
  }
  func.func @transform_5(%arg0: i32) -> (i32, i32, i32) {
    %c0_i32 = arith.constant 0 : i32
    %c0_i32_0 = arith.constant 0 : i32
    %c0_i32_1 = arith.constant 0 : i32
    %c0_i32_2 = arith.constant 0 : i32
    return %c0_i32, %c0_i32_0, %c0_i32_1 : i32, i32, i32
  }
  func.func @transform_6(%arg0: i32) -> (i32, i32, i32) {
    %c0_i32 = arith.constant 0 : i32
    %c0_i32_0 = arith.constant 0 : i32
    %c0_i32_1 = arith.constant 0 : i32
    %c0_i32_2 = arith.constant 0 : i32
    return %c0_i32, %c0_i32_0, %c0_i32_1 : i32, i32, i32
  }
  func.func @transform_7(%arg0: i32) -> (i32, i32) {
    %c0_i32 = arith.constant 0 : i32
    %c0_i32_0 = arith.constant 0 : i32
    %c0_i32_1 = arith.constant 0 : i32
    return %c0_i32, %c0_i32_0 : i32, i32
  }
}

</mosaic_0001>

<bundles_post_ra>
// kernel: _iql_apply.1
= control target key start
LH: loop header
LB: loop body
LE: loop exit
PB: predicated region body
PF: predicated region fallthrough
CT: control target
= control target key end

     0   :  { %12 = vsyncpa [#allocation3], 0  ;;  %s2357_s0 = inlined_call_operand.vmem [shape: bf16[16,1024], index: 0, kind: input, shape index: {}]   ;;  %s2358_s1 = inlined_call_operand.hbm [shape: bf16[1024,256], index: 1, kind: input, shape index: {}]   ;;  %s2359_s2 = inlined_call_operand.hbm [shape: bf16[2,128,128], index: 2, kind: input, shape index: {}]   ;;  %s2360_s3 = inlined_call_operand.hbm [shape: bf16[2,128,128], index: 3, kind: input, shape index: {}]   ;;  %s2361_s4 = inlined_call_operand.vmem [shape: f32[1,256], index: 4, kind: input, shape index: {}]   ;;  %s2362_s5 = inlined_call_operand.vmem [shape: f32[2,1,128], index: 5, kind: input, shape index: {}]   ;;  %s2363_s6 = inlined_call_operand.vmem [shape: f32[2,1,128], index: 6, kind: input, shape index: {}]   ;;  %s2364_s7 = inlined_call_operand.vmem [shape: f32[16,256], index: 7, kind: output, shape index: {}]  }
   0x1   :  { %13 = vsyncpa [#allocation5], 0  ;;  %s2151_s24 = smov [#allocation4]   ;;  %s2081_s28 = scalar_lea.hbm %s2359_s2, 2048 }
   0x2   :  { %s33_s25 = sshll.u32 %s2151_s24, 4  ;;  %p2082_p0 = scmp.ne.s32.totalorder %s2359_s2, %s2081_s28  ;;  %s34_s25 = int_to_ptr.vmem [resolvable:$true] %s33_s25 }
   0x3   :  { %p2085_p1 = scmp.lt.u32.totalorder %s2081_s28, %s2359_s2 }
   0x5   :  { %p2087_p2 = pnand %p2085_p1, %p2082_p0 }
   0x7   :  { %2090 = shalt.err (!%p2087_p2)
}
   0x8   :  { %s2091_s10 = scalar_lea.vmem %s34_s25, 2048  ;;  %p2096_p4 = scmp.lt.s32.totalorder %s34_s25, %s34_s25 }
   0x9   :  { %p2092_p3 = scmp.ne.s32.totalorder %s34_s25, %s2091_s10  ;;  %p2097_p5 = scmp.lt.s32.totalorder %s2091_s10, %s2091_s10 }
   0xb   :  { %p2098_p6 = por %p2097_p5, %p2096_p4 }
   0xd   :  { %p2099_p7 = pnand %p2098_p6, %p2092_p3 }
   0xf   :  { %2102 = shalt.err (!%p2099_p7)
}
  0x10   :  { %s2152_s11 = smov 64   ;;  %s2153_s12 = smov 4  }
  0x11   :  { %39 = dma.hbm_to_vmem [thread:$0]  %s2359_s2, 2048, %s34_s25, [#allocation5], %s2152_s11, %s2152_s11, %s2153_s12  }
  0x12   :  { %s2154_s15 = smov [#allocation2]   ;;  %s2103_s19 = scalar_lea.hbm %s2358_s1, 16384 }
  0x13   :  { %s21_s16 = sshll.u32 %s2154_s15, 4  ;;  %p2104_p8 = scmp.ne.s32.totalorder %s2358_s1, %s2103_s19  ;;  %s22_s16 = int_to_ptr.vmem [resolvable:$true] %s21_s16 }
  0x14   :  { %p2107_p9 = scmp.lt.u32.totalorder %s2103_s19, %s2358_s1 }
  0x16   :  { %p2109_p10 = pnand %p2107_p9, %p2104_p8 }
  0x18   :  { %2112 = shalt.err (!%p2109_p10)
}
  0x19   :  { %s2113_s24 = scalar_lea.vmem %s22_s16, 16384  ;;  %p2118_p12 = scmp.lt.s32.totalorder %s22_s16, %s22_s16 }
  0x1a   :  { %p2114_p11 = scmp.ne.s32.totalorder %s22_s16, %s2113_s24  ;;  %p2119_p13 = scmp.lt.s32.totalorder %s2113_s24, %s2113_s24 }
  0x1c   :  { %p2120_p0 = por %p2119_p13, %p2118_p12 }
  0x1e   :  { %p2121_p1 = pnand %p2120_p0, %p2114_p11 }
  0x20   :  { %2124 = shalt.err (!%p2121_p1)
}
  0x21   :  { %s2155_s2 = smov 128   ;;  %s2156_s25 = smov 8  }
  0x22   :  { %27 = dma.hbm_to_vmem [thread:$0]  %s2358_s1, 16384, %s22_s16, [#allocation3], %s2155_s2, %s2155_s2, %s2156_s25  }
  0x23   :  { %s2157_s28 = smov [#allocation6]   ;;  %s2125_s9 = scalar_lea.hbm %s2360_s3, 2048 }
  0x24   :  { %s45_s29 = sshll.u32 %s2157_s28, 4  ;;  %p2126_p2 = scmp.ne.s32.totalorder %s2360_s3, %s2125_s9  ;;  %s46_s29 = int_to_ptr.vmem [resolvable:$true] %s45_s29 }
  0x25   :  { %p2129_p3 = scmp.lt.u32.totalorder %s2125_s9, %s2360_s3 }
  0x27   :  { %p2131_p4 = pnand %p2129_p3, %p2126_p2 }
  0x29   :  { %2134 = shalt.err (!%p2131_p4)
}
  0x2a   :  { %s2135_s17 = scalar_lea.vmem %s46_s29, 2048  ;;  %p2140_p6 = scmp.lt.s32.totalorder %s46_s29, %s46_s29 }
  0x2b   :  { %p2136_p5 = scmp.ne.s32.totalorder %s46_s29, %s2135_s17  ;;  %p2141_p7 = scmp.lt.s32.totalorder %s2135_s17, %s2135_s17 }
  0x2d   :  { %p2142_p8 = por %p2141_p7, %p2140_p6 }
  0x2f   :  { %p2143_p9 = pnand %p2142_p8, %p2136_p5 }
  0x31   :  { %2146 = shalt.err (!%p2143_p9)
}
  0x32   :  { %51 = dma.hbm_to_vmem [thread:$0]  %s2360_s3, 2048, %s46_s29, [#allocation5], %s2152_s11, %s2152_s11, %s2153_s12  }
  0x33   :  { %2147 = dma.done.wait [#allocation3], 16384  }
  0x34   :  { %2148 = vsyncadd [#allocation3], 4294950912 }
  0x35   :  { %2149 = dma.done.wait [#allocation5], 4096  }
  0x36   :  { %2150 = vsyncadd [#allocation5], 4294963200  ;;  %v1857_v0 = vld [vmem:[#allocation2 + $0x104] ss:$8 sps:$4 sm:$0xff]   ;;  %v1859_v1 = vld [vmem:[#allocation2 + $0x100] ss:$8 sps:$4 sm:$0xff]  }
  0x37   :  { %939 = vmatprep.subr.bf16.mxu0 %v1857_v0  ;;  %v1860_v2 = vld [vmem:[#allocation2 + $0x114] ss:$8 sps:$4 sm:$0xff]   ;;  %v1862_v3 = vld [vmem:[#allocation2 + $0x110] ss:$8 sps:$4 sm:$0xff]   ;;  %v1863_v4 = vld [vmem:[#allocation2 + $0x124] ss:$8 sps:$4 sm:$0xff]  }
  0x38   :  { %940 = vmatpush1.bf16.msra.mxu0 %v1859_v1  ;;  %v1865_v5 = vld [vmem:[#allocation2 + $0x120] ss:$8 sps:$4 sm:$0xff]   ;;  %v1866_v6 = vld [vmem:[#allocation2 + $0x134] ss:$8 sps:$4 sm:$0xff]   ;;  %v1868_v7 = vld [vmem:[#allocation2 + $0x130] ss:$8 sps:$4 sm:$0xff]  }
  0x39   :  { %941 = vmatprep.subr.bf16.mxu0 %v1860_v2  ;;  %v1869_v8 = vld [vmem:[#allocation2 + $0x144] ss:$8 sps:$4 sm:$0xff]   ;;  %v1871_v9 = vld [vmem:[#allocation2 + $0x140] ss:$8 sps:$4 sm:$0xff]   ;;  %v1872_v10 = vld [vmem:[#allocation2 + $0x154] ss:$8 sps:$4 sm:$0xff]  }
  0x3a   :  { %v1874_v11 = vld [vmem:[#allocation2 + $0x150] ss:$8 sps:$4 sm:$0xff]   ;;  %v1875_v12 = vld [vmem:[#allocation2 + $0x164] ss:$8 sps:$4 sm:$0xff]   ;;  %v1877_v16 = vld [vmem:[#allocation2 + $0x160] ss:$8 sps:$4 sm:$0xff]  }
  0x3b   :  { %v2245_v13 = vld [vmem:[%s2357_s0 + $0x8] sm:$0xff]  ;;  %v1878_v17 = vld [vmem:[#allocation2 + $0x174] ss:$8 sps:$4 sm:$0xff]   ;;  %v1880_v18 = vld [vmem:[#allocation2 + $0x170] ss:$8 sps:$4 sm:$0xff]   ;;  %vm2159_vm0 = vmmov 0  }
  0x3c   :  { %942 = vmatpush1.bf16.msra.mxu0 %v1862_v3  ;;  %v2250_v14 = vld [vmem:[%s2357_s0 + $0x28] sm:$0xff]  ;;  %v1884_v21 = vld [vmem:[#allocation2 + $0x194] ss:$8 sps:$4 sm:$0xff]   ;;  %v1886_v22 = vld [vmem:[#allocation2 + $0x190] ss:$8 sps:$4 sm:$0xff]  }
  0x3d   :  { %943 = vmatprep.subr.bf16.mxu0 %v1863_v4  ;;  %v1545_v15 = vcombine.high %v2245_v13, %v2250_v14  ;;  %v1881_v19 = vld [vmem:[#allocation2 + $0x184] ss:$8 sps:$4 sm:$0xff]   ;;  %v1883_v20 = vld [vmem:[#allocation2 + $0x180] ss:$8 sps:$4 sm:$0xff]   ;;  %v1890_v25 = vld [vmem:[#allocation2 + $0x1b4] ss:$8 sps:$4 sm:$0xff]   ;;  %v1544_v50 = vcombine.low %v2245_v13, %v2250_v14 }
  0x3e   :  { %v1887_v23 = vld [vmem:[#allocation2 + $0x1a4] ss:$8 sps:$4 sm:$0xff]   ;;  %v1889_v24 = vld [vmem:[#allocation2 + $0x1a0] ss:$8 sps:$4 sm:$0xff]   ;;  %v1892_v26 = vld [vmem:[#allocation2 + $0x1b0] ss:$8 sps:$4 sm:$0xff]  }
  0x3f   :  { %971 = vmatprep.mubr.bf16.mxu0 %v1545_v15  ;;  %v1950_v27 = vld [vmem:[#allocation2 + $0x4] ss:$8 sps:$4 sm:$0xff]   ;;  %v1952_v28 = vld [vmem:[#allocation2] ss:$8 sps:$4 sm:$0xff]   ;;  %v1956_v30 = vld [vmem:[#allocation2 + $0x14] ss:$8 sps:$4 sm:$0xff]  }
  0x40   :  { %944 = vmatpush1.bf16.msra.mxu0 %v1865_v5  ;;  %v1893_v29 = vld [vmem:[#allocation2 + $0x1c4] ss:$8 sps:$4 sm:$0xff]   ;;  %896 = vmatprep.subr.bf16.mxu1 %v1950_v27  ;;  %v1958_v31 = vld [vmem:[#allocation2 + $0x10] ss:$8 sps:$4 sm:$0xff]   ;;  %v1895_v32 = vld [vmem:[#allocation2 + $0x1c0] ss:$8 sps:$4 sm:$0xff]  }
  0x41   :  { %945 = vmatprep.subr.bf16.mxu0 %v1866_v6  ;;  %897 = vmatpush1.bf16.msra.mxu1 %v1952_v28  ;;  %v1896_v33 = vld [vmem:[#allocation2 + $0x1d4] ss:$8 sps:$4 sm:$0xff]   ;;  %v1962_v34 = vld [vmem:[#allocation2 + $0x24] ss:$8 sps:$4 sm:$0xff]   ;;  %v1964_v35 = vld [vmem:[#allocation2 + $0x20] ss:$8 sps:$4 sm:$0xff]  }
  0x42   :  { %898 = vmatprep.subr.bf16.mxu1 %v1956_v30  ;;  %v1898_v36 = vld [vmem:[#allocation2 + $0x1d0] ss:$8 sps:$4 sm:$0xff]   ;;  %v1968_v37 = vld [vmem:[#allocation2 + $0x34] ss:$8 sps:$4 sm:$0xff]   ;;  %v1899_v38 = vld [vmem:[#allocation2 + $0x1e4] ss:$8 sps:$4 sm:$0xff]  }
  0x43   :  { %v1970_v39 = vld [vmem:[#allocation2 + $0x30] ss:$8 sps:$4 sm:$0xff]   ;;  %v1974_v40 = vld [vmem:[#allocation2 + $0x44] ss:$8 sps:$4 sm:$0xff]   ;;  %v1901_v41 = vld [vmem:[#allocation2 + $0x1e0] ss:$8 sps:$4 sm:$0xff]  }
  0x44   :  { %946 = vmatpush1.bf16.msra.mxu0 %v1868_v7  ;;  %v1902_v42 = vld [vmem:[#allocation2 + $0x1f4] ss:$8 sps:$4 sm:$0xff]   ;;  %v1976_v43 = vld [vmem:[#allocation2 + $0x40] ss:$8 sps:$4 sm:$0xff]   ;;  %v1904_v44 = vld [vmem:[#allocation2 + $0x1f0] ss:$8 sps:$4 sm:$0xff]  }
  0x45   :  { %947 = vmatprep.subr.bf16.mxu0 %v1869_v8  ;;  %899 = vmatpush1.bf16.msra.mxu1 %v1958_v31  ;;  %v1980_v45 = vld [vmem:[#allocation2 + $0x54] ss:$8 sps:$4 sm:$0xff]   ;;  %v1907_v46 = vld [vmem:[#allocation2 + $0x204] ss:$8 sps:$4 sm:$0xff]   ;;  %v1982_v49 = vld [vmem:[#allocation2 + $0x50] ss:$8 sps:$4 sm:$0xff]  }
  0x46   :  { %900 = vmatprep.subr.bf16.mxu1 %v1962_v34  ;;  %v2257_v47 = vld [vmem:[%s2357_s0 + $0x10] sm:$0xff]  ;;  %v1986_v51 = vld [vmem:[#allocation2 + $0x64] ss:$8 sps:$4 sm:$0xff]   ;;  %v1905_v52 = vld [vmem:[#allocation2 + $0x200] ss:$8 sps:$4 sm:$0xff]  }
  0x47   :  { %v2262_v48 = vld [vmem:[%s2357_s0 + $0x30] sm:$0xff]  ;;  %v1988_v55 = vld [vmem:[#allocation2 + $0x60] ss:$8 sps:$4 sm:$0xff]   ;;  %v1913_v58 = vld [vmem:[#allocation2 + $0x224] ss:$8 sps:$4 sm:$0xff]  }
  0x48   :  { %948 = vmatpush1.bf16.msra.mxu0 %v1871_v9  ;;  %v1547_v53 = vcombine.high %v2257_v47, %v2262_v48  ;;  %v1910_v54 = vld [vmem:[#allocation2 + $0x214] ss:$8 sps:$4 sm:$0xff]   ;;  %v1908_v57 = vld [vmem:[#allocation2 + $0x210] ss:$8 sps:$4 sm:$0xff]   ;;  %v1998_v60 = vld [vmem:[#allocation2 + $0x84] ss:$8 sps:$4 sm:$0xff]  }
  0x49   :  { %949 = vmatprep.subr.bf16.mxu0 %v1872_v10  ;;  %901 = vmatpush1.bf16.msra.mxu1 %v1964_v35  ;;  %v1992_v56 = vld [vmem:[#allocation2 + $0x74] ss:$8 sps:$4 sm:$0xff]   ;;  %v1994_v59 = vld [vmem:[#allocation2 + $0x70] ss:$8 sps:$4 sm:$0xff]   ;;  %v1911_v61 = vld [vmem:[#allocation2 + $0x220] ss:$8 sps:$4 sm:$0xff]  }
  0x4a   :  { %902 = vmatprep.subr.bf16.mxu1 %v1968_v37  ;;  %v1916_v62 = vld [vmem:[#allocation2 + $0x234] ss:$8 sps:$4 sm:$0xff]   ;;  %v2000_v63 = vld [vmem:[#allocation2 + $0x80] ss:$8 sps:$4 sm:$0xff]   ;;  %v1914_v1 = vld [vmem:[#allocation2 + $0x230] ss:$8 sps:$4 sm:$0xff]  }
  0x4b   :  { %v2004_v0 = vld [vmem:[#allocation2 + $0x94] ss:$8 sps:$4 sm:$0xff]   ;;  %v1919_v2 = vld [vmem:[#allocation2 + $0x244] ss:$8 sps:$4 sm:$0xff]   ;;  %v2006_v3 = vld [vmem:[#allocation2 + $0x90] ss:$8 sps:$4 sm:$0xff]  }
  0x4c   :  { %950 = vmatpush1.bf16.msra.mxu0 %v1874_v11  ;;  %v2010_v4 = vld [vmem:[#allocation2 + $0xa4] ss:$8 sps:$4 sm:$0xff]   ;;  %v1917_v5 = vld [vmem:[#allocation2 + $0x240] ss:$8 sps:$4 sm:$0xff]   ;;  %v1922_v6 = vld [vmem:[#allocation2 + $0x254] ss:$8 sps:$4 sm:$0xff]  }
  0x4d   :  { %951 = vmatprep.subr.bf16.mxu0 %v1875_v12  ;;  %903 = vmatpush1.bf16.msra.mxu1 %v1970_v39  ;;  %v2012_v7 = vld [vmem:[#allocation2 + $0xa0] ss:$8 sps:$4 sm:$0xff]   ;;  %v2016_v8 = vld [vmem:[#allocation2 + $0xb4] ss:$8 sps:$4 sm:$0xff]   ;;  %v1920_v9 = vld [vmem:[#allocation2 + $0x250] ss:$8 sps:$4 sm:$0xff]  }
  0x4e   :  { %904 = vmatprep.subr.bf16.mxu1 %v1974_v40  ;;  %v1925_v10 = vld [vmem:[#allocation2 + $0x264] ss:$8 sps:$4 sm:$0xff]   ;;  %v2018_v11 = vld [vmem:[#allocation2 + $0xb0] ss:$8 sps:$4 sm:$0xff]   ;;  %v2040_v27 = vld [vmem:[#allocation2 + $0xf4] ss:$8 sps:$4 sm:$0xff]  }
  0x4f   :  { %v68_v12 = vld [vmem:[%s2357_s0] sm:$0xff]  ;;  %v1932_v28 = vld [vmem:[#allocation2 + $0x290] ss:$8 sps:$4 sm:$0xff]   ;;  %v2158_v37 = vmov 0.0   ;;  %v1946_v40 = vld [vmem:[#allocation2 + $0x2d4] ss:$8 sps:$4 sm:$0xff]  }
  0x50   :  { %952 = vmatpush1.bf16.msra.mxu0 %v1877_v16  ;;  %v72_v13 = vld [vmem:[%s2357_s0 + $0x20] sm:$0xff]  ;;  %v2042_v30 = vld [vmem:[#allocation2 + $0xf0] ss:$8 sps:$4 sm:$0xff]  }
  0x51   :  { %953 = vmatprep.subr.bf16.mxu0 %v1878_v17  ;;  %905 = vmatpush1.bf16.msra.mxu1 %v1976_v43  ;;  %v2022_v14 = vld [vmem:[#allocation2 + $0xc4] ss:$8 sps:$4 sm:$0xff]   ;;  %v1543_v15 = vcombine.high %v68_v12, %v72_v13  ;;  %v1923_v16 = vld [vmem:[#allocation2 + $0x260] ss:$8 sps:$4 sm:$0xff]   ;;  %v1928_v17 = vld [vmem:[#allocation2 + $0x274] ss:$8 sps:$4 sm:$0xff]   ;;  %v1542_v34 = vcombine.low %v68_v12, %v72_v13 }
  0x52   :  { %906 = vmatprep.subr.bf16.mxu1 %v1980_v45  ;;  %v1935_v31 = vld [vmem:[#allocation2 + $0x2a0] ss:$8 sps:$4 sm:$0xff]   ;;  %v1938_v35 = vld [vmem:[#allocation2 + $0x2b0] ss:$8 sps:$4 sm:$0xff]   ;;  %v1949_v43 = vld [vmem:[#allocation2 + $0x2e4] ss:$8 sps:$4 sm:$0xff]  }
  0x53   :  { %928 = vmatprep.mubr.bf16.mxu1 %v1543_v15  ;;  %v1941_v39 = vld [vmem:[#allocation2 + $0x2c0] ss:$8 sps:$4 sm:$0xff]   ;;  %v2025_v12 = vld [vmem:[#allocation2 + $0x3b0] ss:$8 sps:$4 sm:$0xff]   ;;  %v2033_v13 = vld [vmem:[#allocation2 + $0x3c4] ss:$8 sps:$4 sm:$0xff]  }
  0x54   :  { %954 = vmatpush1.bf16.msra.mxu0 %v1880_v18  ;;  %v1926_v18 = vld [vmem:[#allocation2 + $0x270] ss:$8 sps:$4 sm:$0xff]   ;;  %v1947_v45 = vld [vmem:[#allocation2 + $0x2e0] ss:$8 sps:$4 sm:$0xff]   ;;  %v2039_v15 = vld [vmem:[#allocation2 + $0x3d4] ss:$8 sps:$4 sm:$0xff]  }
  0x55   :  { %955 = vmatprep.subr.bf16.mxu0 %v1881_v19  ;;  %907 = vmatpush1.bf16.msra.mxu1 %v1982_v49  ;;  %v2024_v19 = vld [vmem:[#allocation2 + $0xc0] ss:$8 sps:$4 sm:$0xff]  }
  0x56   :  { %908 = vmatprep.subr.bf16.mxu1 %v1986_v51  ;;  %v2053_v49 = vld [vmem:[#allocation4 + $0x20] sm:$0xff]  }
  0x57   :  { %v1961_v51 = vld [vmem:[#allocation2 + $0x304] ss:$8 sps:$4 sm:$0xff]  }
  0x58   :  { %956 = vmatpush1.bf16.msra.mxu0 %v1883_v20  ;;  %v1931_v20 = vld [vmem:[#allocation2 + $0x284] ss:$8 sps:$4 sm:$0xff]  }
  0x59   :  { %957 = vmatprep.subr.bf16.mxu0 %v1884_v21  ;;  %909 = vmatpush1.bf16.msra.mxu1 %v1988_v55  ;;  %v2028_v21 = vld [vmem:[#allocation2 + $0xd4] ss:$8 sps:$4 sm:$0xff]   ;;  %v1959_v55 = vld [vmem:[#allocation2 + $0x300] ss:$8 sps:$4 sm:$0xff]  }
  0x5a   :  { %910 = vmatprep.subr.bf16.mxu1 %v1992_v56 }
  0x5c   :  { %958 = vmatpush1.bf16.msra.mxu0 %v1886_v22  ;;  %v2030_v22 = vld [vmem:[#allocation2 + $0xd0] ss:$8 sps:$4 sm:$0xff]  }
  0x5d   :  { %959 = vmatprep.subr.bf16.mxu0 %v1887_v23  ;;  %911 = vmatpush1.bf16.msra.mxu1 %v1994_v59  ;;  %v1929_v23 = vld [vmem:[#allocation2 + $0x280] ss:$8 sps:$4 sm:$0xff]   ;;  %v1973_v59 = vld [vmem:[#allocation2 + $0x324] ss:$8 sps:$4 sm:$0xff]  }
  0x5e   :  { %912 = vmatprep.subr.bf16.mxu1 %v1998_v60  ;;  %v1971_v60 = vld [vmem:[#allocation2 + $0x320] ss:$8 sps:$4 sm:$0xff]  }
  0x60   :  { %960 = vmatpush1.bf16.msra.mxu0 %v1889_v24  ;;  %v2034_v24 = vld [vmem:[#allocation2 + $0xe4] ss:$8 sps:$4 sm:$0xff]  }
  0x61   :  { %961 = vmatprep.subr.bf16.mxu0 %v1890_v25  ;;  %913 = vmatpush1.bf16.msra.mxu1 %v2000_v63  ;;  %v1934_v25 = vld [vmem:[#allocation2 + $0x294] ss:$8 sps:$4 sm:$0xff]  }
  0x62   :  { %914 = vmatprep.subr.bf16.mxu1 %v2004_v0  ;;  %v1991_v63 = vld [vmem:[#allocation2 + $0x354] ss:$8 sps:$4 sm:$0xff]   ;;  %v1989_v0 = vld [vmem:[#allocation2 + $0x350] ss:$8 sps:$4 sm:$0xff]  }
  0x64   :  { %962 = vmatpush1.bf16.msra.mxu0 %v1892_v26  ;;  %v2036_v26 = vld [vmem:[#allocation2 + $0xe0] ss:$8 sps:$4 sm:$0xff]  }
  0x65   :  { %963 = vmatprep.subr.bf16.mxu0 %v1893_v29  ;;  %915 = vmatpush1.bf16.msra.mxu1 %v2006_v3  ;;  %v1937_v29 = vld [vmem:[#allocation2 + $0x2a4] ss:$8 sps:$4 sm:$0xff]   ;;  %v2003_v3 = vld [vmem:[#allocation2 + $0x374] ss:$8 sps:$4 sm:$0xff]  }
  0x66   :  { %916 = vmatprep.subr.bf16.mxu1 %v2010_v4  ;;  %v2001_v4 = vld [vmem:[#allocation2 + $0x370] ss:$8 sps:$4 sm:$0xff]  }
  0x68   :  { %964 = vmatpush1.bf16.msra.mxu0 %v1895_v32  ;;  %v1940_v32 = vld [vmem:[#allocation2 + $0x2b4] ss:$8 sps:$4 sm:$0xff]  }
  0x69   :  { %965 = vmatprep.subr.bf16.mxu0 %v1896_v33  ;;  %917 = vmatpush1.bf16.msra.mxu1 %v2012_v7  ;;  %v2049_v33 = vld [vmem:[#allocation4] sm:$0xff]   ;;  %v2015_v7 = vld [vmem:[#allocation2 + $0x394] ss:$8 sps:$4 sm:$0xff]  }
  0x6a   :  { %918 = vmatprep.subr.bf16.mxu1 %v2016_v8  ;;  %v2013_v8 = vld [vmem:[#allocation2 + $0x390] ss:$8 sps:$4 sm:$0xff]  }
  0x6c   :  { %966 = vmatpush1.bf16.msra.mxu0 %v1898_v36  ;;  %v1943_v36 = vld [vmem:[#allocation2 + $0x2c4] ss:$8 sps:$4 sm:$0xff]  }
  0x6d   :  { %967 = vmatprep.subr.bf16.mxu0 %v1899_v38  ;;  %919 = vmatpush1.bf16.msra.mxu1 %v2018_v11  ;;  %v2050_v38 = vld [vmem:[#allocation4 + $0x8] sm:$0xff]   ;;  %v2027_v11 = vld [vmem:[#allocation2 + $0x3b4] ss:$8 sps:$4 sm:$0xff]  }
  0x6e   :  { %920 = vmatprep.subr.bf16.mxu1 %v2022_v14  ;;  %v2031_v14 = vld [vmem:[#allocation2 + $0x3c0] ss:$8 sps:$4 sm:$0xff]  }
  0x70   :  { %968 = vmatpush1.bf16.msra.mxu0 %v1901_v41  ;;  %v2051_v41 = vld [vmem:[#allocation4 + $0x10] sm:$0xff]  }
  0x71   :  { %969 = vmatprep.subr.bf16.mxu0 %v1902_v42  ;;  %921 = vmatpush1.bf16.msra.mxu1 %v2024_v19  ;;  %v1944_v42 = vld [vmem:[#allocation2 + $0x2d0] ss:$8 sps:$4 sm:$0xff]   ;;  %v2048_v19 = vld [vmem:[#allocation2 + $0x3f4] ss:$8 sps:$4 sm:$0xff]  }
  0x72   :  { %922 = vmatprep.subr.bf16.mxu1 %v2028_v21 }
  0x74   :  { %970 = vmatpush1.bf16.msra.mxu0 %v1904_v44  ;;  %v2052_v44 = vld [vmem:[#allocation4 + $0x18] sm:$0xff]  }
  0x75   :  { %982 = vmatprep.subr.bf16.mxu0 %v1907_v46  ;;  %923 = vmatpush1.bf16.msra.mxu1 %v2030_v22  ;;  %v1955_v46 = vld [vmem:[#allocation2 + $0x2f4] ss:$8 sps:$4 sm:$0xff]   ;;  %v2054_v22 = vld [vmem:[#allocation4 + $0x28] sm:$0xff]  }
  0x76   :  { %924 = vmatprep.subr.bf16.mxu1 %v2034_v24  ;;  %v2056_v24 = vld [vmem:[#allocation4 + $0x38] sm:$0xff]  }
  0x77   :  { %972 = vmatmul.mubr.bf16.vlgmr.msra.gmra.mrb[0].mxu0 %v1544_v50  ;;  %v1953_v50 = vld [vmem:[#allocation2 + $0x2f0] ss:$8 sps:$4 sm:$0xff]  }
  0x78   :  { %983 = vmatpush1.bf16.msra.mxu0 %v1905_v52  ;;  %1014 = vmatprep.mubr.bf16.mxu0 %v1547_v53  ;;  %v2282_v52 = vld [vmem:[%s2357_s0 + $0x18] sm:$0xff] }
  0x79   :  { %984 = vmatprep.subr.bf16.mxu0 %v1910_v54  ;;  %925 = vmatpush1.bf16.msra.mxu1 %v2036_v26  ;;  %v2287_v53 = vld [vmem:[%s2357_s0 + $0x38] sm:$0xff]  ;;  %v1546_v54 = vcombine.low %v2257_v47, %v2262_v48  ;;  %v1985_v48 = vld [vmem:[#allocation2 + $0x344] ss:$8 sps:$4 sm:$0xff]  }
  0x7a   :  { %926 = vmatprep.subr.bf16.mxu1 %v2040_v27  ;;  %v1549_v56 = vcombine.high %v2282_v52, %v2287_v53  ;;  %v1977_v47 = vld [vmem:[#allocation2 + $0x330] ss:$8 sps:$4 sm:$0xff]   ;;  %v1548_v21 = vcombine.low %v2282_v52, %v2287_v53 }
  0x7c   :  { %985 = vmatpush1.bf16.msra.mxu0 %v1908_v57  ;;  %v1967_v57 = vld [vmem:[#allocation2 + $0x314] ss:$8 sps:$4 sm:$0xff]  }
  0x7d   :  { %986 = vmatprep.subr.bf16.mxu0 %v1913_v58  ;;  %927 = vmatpush1.bf16.msra.mxu1 %v2042_v30  ;;  %v1965_v58 = vld [vmem:[#allocation2 + $0x310] ss:$8 sps:$4 sm:$0xff]  }
  0x7e   :  { %1752 = vmatprep.subr.bf16.mxu1 %v2158_v37 }
  0x80   :  { %987 = vmatpush1.bf16.msra.mxu0 %v1911_v61  ;;  %929 = vmatmul.mubr.bf16.vlgmr.msra.gmra.mrb[0].mxu1 %v1542_v34  ;;  %v1979_v61 = vld [vmem:[#allocation2 + $0x334] ss:$8 sps:$4 sm:$0xff]  }
  0x81   :  { %988 = vmatprep.subr.bf16.mxu0 %v1916_v62  ;;  %1753 = vmatpush3.bf16.msra.mxu1 %v2049_v33  ;;  %v1983_v62 = vld [vmem:[#allocation2 + $0x340] ss:$8 sps:$4 sm:$0xff]  }
  0x82   :  { %1754 = vmatprep.subr.bf16.mxu1 %v2158_v37  ;;  %1768 = vmatprep.mubr.msk.bf16.mxu1 %vm2159_vm0, %v2158_v37 }
  0x84   :  { %989 = vmatpush1.bf16.msra.mxu0 %v1914_v1  ;;  %v1997_v1 = vld [vmem:[#allocation2 + $0x364] ss:$8 sps:$4 sm:$0xff]  }
  0x85   :  { %990 = vmatprep.subr.bf16.mxu0 %v1919_v2  ;;  %1755 = vmatpush3.bf16.msra.mxu1 %v2050_v38  ;;  %v1995_v2 = vld [vmem:[#allocation2 + $0x360] ss:$8 sps:$4 sm:$0xff]  }
  0x86   :  { %1756 = vmatprep.subr.bf16.mxu1 %v2158_v37 }
  0x88   :  { %991 = vmatpush1.bf16.msra.mxu0 %v1917_v5  ;;  %v2009_v5 = vld [vmem:[#allocation2 + $0x384] ss:$8 sps:$4 sm:$0xff]  }
  0x89   :  { %992 = vmatprep.subr.bf16.mxu0 %v1922_v6  ;;  %1757 = vmatpush3.bf16.msra.mxu1 %v2051_v41  ;;  %v2007_v6 = vld [vmem:[#allocation2 + $0x380] ss:$8 sps:$4 sm:$0xff]  }
  0x8a   :  { %1758 = vmatprep.subr.bf16.mxu1 %v2158_v37 }
  0x8c   :  { %993 = vmatpush1.bf16.msra.mxu0 %v1920_v9  ;;  %v2021_v9 = vld [vmem:[#allocation2 + $0x3a4] ss:$8 sps:$4 sm:$0xff]  }
  0x8d   :  { %994 = vmatprep.subr.bf16.mxu0 %v1925_v10  ;;  %1759 = vmatpush3.bf16.msra.mxu1 %v2052_v44  ;;  %v2019_v10 = vld [vmem:[#allocation2 + $0x3a0] ss:$8 sps:$4 sm:$0xff]  }
  0x8e   :  { %1760 = vmatprep.subr.bf16.mxu1 %v2158_v37 }
  0x90   :  { %995 = vmatpush1.bf16.msra.mxu0 %v1923_v16  ;;  %v2037_v16 = vld [vmem:[#allocation2 + $0x3d0] ss:$8 sps:$4 sm:$0xff]  }
  0x91   :  { %996 = vmatprep.subr.bf16.mxu0 %v1928_v17  ;;  %1761 = vmatpush3.bf16.msra.mxu1 %v2053_v49  ;;  %v2045_v17 = vld [vmem:[#allocation2 + $0x3e4] ss:$8 sps:$4 sm:$0xff]  }
  0x92   :  { %1762 = vmatprep.subr.bf16.mxu1 %v2158_v37 }
  0x94   :  { %997 = vmatpush1.bf16.msra.mxu0 %v1926_v18  ;;  %v2043_v18 = vld [vmem:[#allocation2 + $0x3e0] ss:$8 sps:$4 sm:$0xff]  }
  0x95   :  { %998 = vmatprep.subr.bf16.mxu0 %v1931_v20  ;;  %v2046_v20 = vld [vmem:[#allocation2 + $0x3f0] ss:$8 sps:$4 sm:$0xff]   ;;  %1763 = vmatpush3.bf16.msra.mxu1 %v2054_v22  ;;  %v2078_v22 = vld [vmem:[#allocation6 + $0x68] sm:$0xff]  }
  0x96   :  { %1764 = vmatprep.subr.bf16.mxu1 %v2158_v37 }
  0x98   :  { %999 = vmatpush1.bf16.msra.mxu0 %v1929_v23  ;;  %v2055_v23 = vld [vmem:[#allocation4 + $0x30] sm:$0xff]  }
  0x99   :  { %1000 = vmatprep.subr.bf16.mxu0 %v1934_v25  ;;  %1765 = vmatpush3.bf16.msra.mxu1 %v2055_v23  ;;  %v2079_v23 = vld [vmem:[#allocation6 + $0x70] sm:$0xff]  }
  0x9a   :  { %1766 = vmatprep.subr.bf16.mxu1 %v2158_v37 }
  0x9c   :  { %1001 = vmatpush1.bf16.msra.mxu0 %v1932_v28 }
  0x9d   :  { %1002 = vmatprep.subr.bf16.mxu0 %v1937_v29  ;;  %1767 = vmatpush3.bf16.msra.mxu1 %v2056_v24  ;;  %v206_v29 = vlaneseq  ;;  %v2080_v24 = vld [vmem:[#allocation6 + $0x78] sm:$0xff]  }
  0x9e   :  { %1772 = vmatprep.subr.bf16.mxu1 %v2158_v37 }
  0x9f   :  { %v207_v30 = vshrl.u32 %v206_v29, 7 }
  0xa0   :  { %1003 = vmatpush1.bf16.msra.mxu0 %v1935_v31 }
  0xa1   :  { %1004 = vmatprep.subr.bf16.mxu0 %v1940_v32  ;;  %v208_v31 = vsub.s32 0, %v207_v30  ;;  %v204_v32 = vld [vmem:[%s2361_s4] sm:$0x3]  ;;  %v212_v33 = vsub.s32 1, %v207_v30 }
  0xa3   :  { %v209_v34 = vrot.slane %v204_v32, %v208_v31 }
  0xa4   :  { %1005 = vmatpush1.bf16.msra.mxu0 %v1938_v35  ;;  %v213_v35 = vrot.slane %v204_v32, %v212_v33 }
  0xa5   :  { %1006 = vmatprep.subr.bf16.mxu0 %v1943_v36 }
  0xa8   :  { %1007 = vmatpush1.bf16.msra.mxu0 %v1941_v39 }
  0xa9   :  { %1008 = vmatprep.subr.bf16.mxu0 %v1946_v40 }
  0xac   :  { %1009 = vmatpush1.bf16.msra.mxu0 %v1944_v42 }
  0xad   :  { %1010 = vmatprep.subr.bf16.mxu0 %v1949_v43 }
  0xb0   :  { %1011 = vmatpush1.bf16.msra.mxu0 %v1947_v45 }
  0xb1   :  { %1012 = vmatprep.subr.bf16.mxu0 %v1955_v46 }
  0xb4   :  { %1013 = vmatpush1.bf16.msra.mxu0 %v1953_v50 }
  0xb5   :  { %1025 = vmatprep.subr.bf16.mxu0 %v1961_v51 }
  0xb7   :  { %1015 = vmatmul.mubr.bf16.vlgmr.msra.gmra.mrb[0].mxu0 %v1546_v54 }
  0xb8   :  { %1026 = vmatpush1.bf16.msra.mxu0 %v1959_v55  ;;  %1057 = vmatprep.mubr.bf16.mxu0 %v1549_v56  ;;  %v2057_v55 = vld [vmem:[#allocation6] sm:$0xff]  }
  0xb9   :  { %1027 = vmatprep.subr.bf16.mxu0 %v1967_v57 }
  0xbc   :  { %1028 = vmatpush1.bf16.msra.mxu0 %v1965_v58  ;;  %v2058_v58 = vld [vmem:[#allocation6 + $0x8] sm:$0xff]  }
  0xbd   :  { %1029 = vmatprep.subr.bf16.mxu0 %v1973_v59  ;;  %v2059_v59 = vld [vmem:[#allocation6 + $0x10] sm:$0xff]  }
  0xc0   :  { %1030 = vmatpush1.bf16.msra.mxu0 %v1971_v60  ;;  %v2060_v60 = vld [vmem:[#allocation6 + $0x18] sm:$0xff]  }
  0xc1   :  { %1031 = vmatprep.subr.bf16.mxu0 %v1979_v61  ;;  %v2061_v61 = vld [vmem:[#allocation6 + $0x20] sm:$0xff]  }
  0xc4   :  { %1032 = vmatpush1.bf16.msra.mxu0 %v1977_v47  ;;  %v2062_v47 = vld [vmem:[#allocation6 + $0x28] sm:$0xff]  }
  0xc5   :  { %1033 = vmatprep.subr.bf16.mxu0 %v1985_v48  ;;  %v2063_v48 = vld [vmem:[#allocation6 + $0x30] sm:$0xff]  }
  0xc8   :  { %1034 = vmatpush1.bf16.msra.mxu0 %v1983_v62  ;;  %v2064_v62 = vld [vmem:[#allocation6 + $0x38] sm:$0xff]  }
  0xc9   :  { %1035 = vmatprep.subr.bf16.mxu0 %v1991_v63  ;;  %v1678_v63 = vld [vmem:[%s2362_s5] ss:$0 sm:$0xff] }
  0xcc   :  { %1036 = vmatpush1.bf16.msra.mxu0 %v1989_v0 }
  0xcd   :  { %1037 = vmatprep.subr.bf16.mxu0 %v1997_v1 }
  0xd0   :  { %1038 = vmatpush1.bf16.msra.mxu0 %v1995_v2 }
  0xd1   :  { %1039 = vmatprep.subr.bf16.mxu0 %v2003_v3 }
  0xd4   :  { %1040 = vmatpush1.bf16.msra.mxu0 %v2001_v4 }
  0xd5   :  { %1041 = vmatprep.subr.bf16.mxu0 %v2009_v5 }
  0xd8   :  { %1042 = vmatpush1.bf16.msra.mxu0 %v2007_v6 }
  0xd9   :  { %1043 = vmatprep.subr.bf16.mxu0 %v2015_v7 }
  0xdc   :  { %1044 = vmatpush1.bf16.msra.mxu0 %v2013_v8  ;;  %v2065_v8 = vld [vmem:[#allocation4 + $0x40] sm:$0xff]  }
  0xdd   :  { %1045 = vmatprep.subr.bf16.mxu0 %v2021_v9 }
  0xe0   :  { %1046 = vmatpush1.bf16.msra.mxu0 %v2019_v10  ;;  %v2066_v10 = vld [vmem:[#allocation4 + $0x48] sm:$0xff]  }
  0xe1   :  { %1047 = vmatprep.subr.bf16.mxu0 %v2027_v11  ;;  %v2067_v11 = vld [vmem:[#allocation4 + $0x50] sm:$0xff]  }
  0xe4   :  { %1048 = vmatpush1.bf16.msra.mxu0 %v2025_v12  ;;  %v2068_v12 = vld [vmem:[#allocation4 + $0x58] sm:$0xff]  }
  0xe5   :  { %1049 = vmatprep.subr.bf16.mxu0 %v2033_v13  ;;  %v2069_v13 = vld [vmem:[#allocation4 + $0x60] sm:$0xff]  }
  0xe8   :  { %1050 = vmatpush1.bf16.msra.mxu0 %v2031_v14  ;;  %v2070_v14 = vld [vmem:[#allocation4 + $0x68] sm:$0xff]  }
  0xe9   :  { %1051 = vmatprep.subr.bf16.mxu0 %v2039_v15  ;;  %v2071_v15 = vld [vmem:[#allocation4 + $0x70] sm:$0xff]  }
  0xec   :  { %1052 = vmatpush1.bf16.msra.mxu0 %v2037_v16  ;;  %v2072_v16 = vld [vmem:[#allocation4 + $0x78] sm:$0xff]  }
  0xed   :  { %1053 = vmatprep.subr.bf16.mxu0 %v2045_v17  ;;  %v2073_v17 = vld [vmem:[#allocation6 + $0x40] sm:$0xff]  }
  0xf0   :  { %1054 = vmatpush1.bf16.msra.mxu0 %v2043_v18  ;;  %v2074_v18 = vld [vmem:[#allocation6 + $0x48] sm:$0xff]  }
  0xf1   :  { %1055 = vmatprep.subr.bf16.mxu0 %v2048_v19  ;;  %v2075_v19 = vld [vmem:[#allocation6 + $0x50] sm:$0xff]  }
  0xf4   :  { %1056 = vmatpush1.bf16.msra.mxu0 %v2046_v20  ;;  %v2076_v20 = vld [vmem:[#allocation6 + $0x58] sm:$0xff]  }
  0xf7   :  { %1058 = vmatmul.mubr.bf16.vlgmr.msra.gmra.mrb[0].mxu0 %v1548_v21  ;;  %v2077_v21 = vld [vmem:[#allocation6 + $0x60] sm:$0xff]  }
 0x153   :  { %v930_v25 = vpop.f32.mrb[0].mxu1 }
 0x154   :  { %v932_v26 = vpop.f32.mrb[1].mxu1  ;;  %v931_v36 = vadd.f32 %v930_v25, %v209_v34  ;;  %v1687_v25 = vld [vmem:[%s2363_s6] ss:$0 sm:$0xff] }
 0x155   :  { %v934_v27 = vpop.f32.mrb[2].mxu1  ;;  %v933_v38 = vadd.f32 %v932_v26, %v213_v35 }
 0x156   :  { %v936_v28 = vpop.f32.mrb[3].mxu1  ;;  %v935_v40 = vadd.f32 %v934_v27, %v209_v34 }
 0x157   :  { %v937_v43 = vadd.f32 %v936_v28, %v213_v35 }
 0x1ca   :  { %v1059_v39 = vpop.f32.mrb[0].mxu0 }
 0x1cb   :  { %v1833_v41 = vadd.f32 %v1059_v39, %v931_v36  ;;  %v1061_v42 = vpop.f32.mrb[1].mxu0 }
 0x1cc   :  { %v1835_v44 = vadd.f32 %v1061_v42, %v933_v38  ;;  %v1063_v45 = vpop.f32.mrb[2].mxu0  ;;  %v1707_v42 = vld [vmem:[%s2363_s6 + $0x1] ss:$0 sm:$0xff] }
 0x1cd   :  { %v1837_v46 = vadd.f32 %v1063_v45, %v935_v40  ;;  %v1065_v49 = vpop.f32.mrb[3].mxu0  ;;  %v1068_v51 = vmax.f32 %v1833_v41, 0.0 }
 0x1ce   :  { %v1839_v50 = vadd.f32 %v1065_v49, %v937_v43  ;;  %v1069_v53 = vmax.f32 %v1835_v44, 0.0 }
 0x1cf   :  { %v1070_v52 = vmax.f32 %v1837_v46, 0.0 }
 0x1d0   :  { %v1071_v54 = vmax.f32 %v1839_v50, 0.0 }
 0x1d1   :  { %v1072_v56 = vpack.c.bf16 %v1070_v52, %v1068_v51 }
 0x1d2   :  { %v1073_v57 = vpack.c.bf16 %v1071_v54, %v1069_v53 }
 0x1d3   :  { %1769 = vmatmul.mubr.bf16.vlgmr.msra.gmra.mrb[4].mxu1 %v1072_v56 }
 0x1d4   :  { %1773 = vmatpush3.bf16.msra.mxu1 %v2057_v55  ;;  %1788 = vmatprep.mubr.msk.bf16.mxu1 %vm2159_vm0, %v2158_v37 }
 0x1d5   :  { %1774 = vmatprep.subr.bf16.mxu1 %v2158_v37 }
 0x1d8   :  { %1775 = vmatpush3.bf16.msra.mxu1 %v2058_v58 }
 0x1d9   :  { %1776 = vmatprep.subr.bf16.mxu1 %v2158_v37 }
 0x1dc   :  { %1777 = vmatpush3.bf16.msra.mxu1 %v2059_v59 }
 0x1dd   :  { %1778 = vmatprep.subr.bf16.mxu1 %v2158_v37 }
 0x1e0   :  { %1779 = vmatpush3.bf16.msra.mxu1 %v2060_v60 }
 0x1e1   :  { %1780 = vmatprep.subr.bf16.mxu1 %v2158_v37 }
 0x1e4   :  { %1781 = vmatpush3.bf16.msra.mxu1 %v2061_v61 }
 0x1e5   :  { %1782 = vmatprep.subr.bf16.mxu1 %v2158_v37 }
 0x1e8   :  { %1783 = vmatpush3.bf16.msra.mxu1 %v2062_v47 }
 0x1e9   :  { %1784 = vmatprep.subr.bf16.mxu1 %v2158_v37 }
 0x1ec   :  { %1785 = vmatpush3.bf16.msra.mxu1 %v2063_v48 }
 0x1ed   :  { %1786 = vmatprep.subr.bf16.mxu1 %v2158_v37 }
 0x1f0   :  { %1787 = vmatpush3.bf16.msra.mxu1 %v2064_v62 }
 0x1f1   :  { %1792 = vmatprep.subr.bf16.mxu1 %v2158_v37 }
 0x2a6   :  { %v1179_v0 = vpop.f32.mrb[4].mxu1 }
 0x2a7   :  { %v1180_v1 = vadd.f32 %v1678_v63, %v1179_v0  ;;  %v1770_v2 = vpop.f32.mrb[5].mxu1 }
 0x2a8   :  { %v1182_v3 = vpop.f32.mrb[6].mxu1 }
 0x2a9   :  { %v1183_v4 = vadd.f32 %v1678_v63, %v1182_v3  ;;  %v1771_v5 = vpop.f32.mrb[7].mxu1  ;;  %v1186_v6 = vmax.f32 %v1180_v1, 0.0 }
 0x2ab   :  { %v1187_v7 = vmax.f32 %v1183_v4, 0.0 }
 0x2ad   :  { %v1188_v9 = vpack.c.bf16 %v1187_v7, %v1186_v6 }
 0x2af   :  { %1789 = vmatmul.mubr.bf16.vlgmr.msra.gmra.mrb[8].mxu1 %v1188_v9 }
 0x2b0   :  { %1793 = vmatpush3.bf16.msra.mxu1 %v2065_v8  ;;  %1808 = vmatprep.mubr.msk.bf16.mxu1 %vm2159_vm0, %v2158_v37 }
 0x2b1   :  { %1794 = vmatprep.subr.bf16.mxu1 %v2158_v37 }
 0x2b4   :  { %1795 = vmatpush3.bf16.msra.mxu1 %v2066_v10 }
 0x2b5   :  { %1796 = vmatprep.subr.bf16.mxu1 %v2158_v37 }
 0x2b8   :  { %1797 = vmatpush3.bf16.msra.mxu1 %v2067_v11 }
 0x2b9   :  { %1798 = vmatprep.subr.bf16.mxu1 %v2158_v37 }
 0x2bc   :  { %1799 = vmatpush3.bf16.msra.mxu1 %v2068_v12 }
 0x2bd   :  { %1800 = vmatprep.subr.bf16.mxu1 %v2158_v37 }
 0x2c0   :  { %1801 = vmatpush3.bf16.msra.mxu1 %v2069_v13 }
 0x2c1   :  { %1802 = vmatprep.subr.bf16.mxu1 %v2158_v37 }
 0x2c4   :  { %1803 = vmatpush3.bf16.msra.mxu1 %v2070_v14 }
 0x2c5   :  { %1804 = vmatprep.subr.bf16.mxu1 %v2158_v37 }
 0x2c8   :  { %1805 = vmatpush3.bf16.msra.mxu1 %v2071_v15 }
 0x2c9   :  { %1806 = vmatprep.subr.bf16.mxu1 %v2158_v37 }
 0x2cc   :  { %1807 = vmatpush3.bf16.msra.mxu1 %v2072_v16 }
 0x2cd   :  { %1812 = vmatprep.subr.bf16.mxu1 %v2158_v37 }
 0x2cf   :  { %1809 = vmatmul.mubr.bf16.vlgmr.msra.gmra.mrb[12].mxu1 %v1073_v57 }
 0x2d0   :  { %1828 = vmatprep.mubr.msk.bf16.mxu1 %vm2159_vm0, %v2158_v37  ;;  %1813 = vmatpush3.bf16.msra.mxu1 %v2073_v17 }
 0x2d1   :  { %1814 = vmatprep.subr.bf16.mxu1 %v2158_v37 }
 0x2d4   :  { %1815 = vmatpush3.bf16.msra.mxu1 %v2074_v18 }
 0x2d5   :  { %1816 = vmatprep.subr.bf16.mxu1 %v2158_v37 }
 0x2d8   :  { %1817 = vmatpush3.bf16.msra.mxu1 %v2075_v19 }
 0x2d9   :  { %1818 = vmatprep.subr.bf16.mxu1 %v2158_v37 }
 0x2dc   :  { %1819 = vmatpush3.bf16.msra.mxu1 %v2076_v20 }
 0x2dd   :  { %1820 = vmatprep.subr.bf16.mxu1 %v2158_v37 }
 0x2e0   :  { %1821 = vmatpush3.bf16.msra.mxu1 %v2077_v21 }
 0x2e1   :  { %1822 = vmatprep.subr.bf16.mxu1 %v2158_v37 }
 0x2e4   :  { %1823 = vmatpush3.bf16.msra.mxu1 %v2078_v22 }
 0x2e5   :  { %1824 = vmatprep.subr.bf16.mxu1 %v2158_v37 }
 0x2e8   :  { %1825 = vmatpush3.bf16.msra.mxu1 %v2079_v23 }
 0x2e9   :  { %1826 = vmatprep.subr.bf16.mxu1 %v2158_v37  ;;  %v1697_v37 = vld [vmem:[%s2362_s5 + $0x1] ss:$0 sm:$0xff] }
 0x2ec   :  { %1827 = vmatpush3.bf16.msra.mxu1 %v2080_v24 }
 0x382   :  { %v1294_v26 = vpop.f32.mrb[8].mxu1 }
 0x383   :  { %v1295_v27 = vadd.f32 %v1687_v25, %v1294_v26  ;;  %v1790_v28 = vpop.f32.mrb[9].mxu1 }
 0x384   :  { %v1297_v29 = vpop.f32.mrb[10].mxu1 }
 0x385   :  { %1301 = vst [vmem:[%s2364_s7] sm:$0xff] %v1295_v27  ;;  %v1298_v30 = vadd.f32 %v1687_v25, %v1297_v29  ;;  %v1791_v31 = vpop.f32.mrb[11].mxu1 }
 0x387   :  { %1302 = vst [vmem:[%s2364_s7 + $0x10] sm:$0xff] %v1298_v30 }
 0x3a2   :  { %v1410_v32 = vpop.f32.mrb[12].mxu1 }
 0x3a3   :  { %v1411_v33 = vadd.f32 %v1697_v37, %v1410_v32  ;;  %v1810_v34 = vpop.f32.mrb[13].mxu1 }
 0x3a4   :  { %v1413_v35 = vpop.f32.mrb[14].mxu1 }
 0x3a5   :  { %v1414_v36 = vadd.f32 %v1697_v37, %v1413_v35  ;;  %v1811_v38 = vpop.f32.mrb[15].mxu1  ;;  %v1417_v39 = vmax.f32 %v1411_v33, 0.0 }
 0x3a7   :  { %v1418_v40 = vmax.f32 %v1414_v36, 0.0 }
 0x3a9   :  { %v1419_v41 = vpack.c.bf16 %v1418_v40, %v1417_v39 }
 0x3ab   :  { %1829 = vmatmul.mubr.bf16.vlgmr.msra.gmra.mrb[16].mxu1 %v1419_v41 }
 0x47e   :  { %v1527_v43 = vpop.f32.mrb[16].mxu1 }
 0x47f   :  { %v1528_v44 = vadd.f32 %v1707_v42, %v1527_v43  ;;  %v1830_v45 = vpop.f32.mrb[17].mxu1 }
 0x480   :  { %v1530_v46 = vpop.f32.mrb[18].mxu1 }
 0x481   :  { %1534 = vst [vmem:[%s2364_s7 + $0x8] sm:$0xff] %v1528_v44  ;;  %v1531_v49 = vadd.f32 %v1707_v42, %v1530_v46  ;;  %v1831_v50 = vpop.f32.mrb[19].mxu1 }
 0x483   :  { %1535 = vst [vmem:[%s2364_s7 + $0x18] sm:$0xff] %v1531_v49 }
 0x484   :  { %1540 = vsyncpa [#allocation3], 1 }
 0x485   :  { %1541 = vsyncpa [#allocation5], 1 }

</bundles_post_ra>
